<compile_context>
chip_gen: v5e
topology: v5e:2x2
jax: 0.10.0
libtpu: 0.0.40
codegen_flags: <defaults>
</compile_context>

<pallas_src>
import math

import jax
import jax.numpy as jnp
from jax.experimental import pallas as pl
from jax.experimental.pallas import tpu as pltpu


def _normalize_kernel(scale_ref, shift_ref, x_ref, o_ref):
    # scale_ref / shift_ref: VMEM f32[block_rows, 1]; x_ref / o_ref: [block_rows, block_cols]
    y = x_ref[...].astype(jnp.float32) * scale_ref[...] + shift_ref[...]
    o_ref[...] = y.astype(o_ref.dtype)


def _round_up(a, b):
    return ((a + b - 1) // b) * b


def _tpu_block_budget():
    """Returns (combined in+out block-bytes target, vmem_limit_bytes or None)."""
    try:
        kind = jax.devices()[0].device_kind.lower()
    except Exception:
        kind = ""
    if "7" in kind:                       # v7x: ~3.2 TB/s HBM, 64 MiB VMEM / TC
        return 16 * 1024 * 1024, 48 * 1024 * 1024
    if "v6" in kind:                      # v6e: ~1.4 TB/s HBM, 32 MiB default scoped
        return 8 * 1024 * 1024, None
    return 4 * 1024 * 1024, None          # v5e / unknown: 16 MiB default scoped limit


def normalize(x, norm=255.0, mean=(0.408, 0.459, 0.482), std=(0.225, 0.224, 0.229),
              donate_x=False):
    """x: [N, C, H, W] (NCHW). Floating inputs keep dtype; integer inputs -> float32."""
    N, C, H, W = x.shape
    if len(mean) != C or len(std) != C:
        raise ValueError(f"len(mean)/len(std) must equal C={C}")

    out_dtype = x.dtype if jnp.issubdtype(x.dtype, jnp.floating) else jnp.float32

    mean_buf = jnp.asarray(mean, jnp.float32) * norm            # running_mean
    var_buf = jnp.asarray(std, jnp.float32) ** 2                # running_var
    weight = jnp.ones((C,), jnp.float32) / norm                 # bn weight
    bias = jnp.zeros((C,), jnp.float32)                         # bn bias
    eps = 0.0  # matches the PyTorch module (explicit eps=0.0)

    # Fold into per-channel affine: out = x * scale + shift
    scale = weight / jnp.sqrt(var_buf + eps)                    # f32[C]
    shift = bias - mean_buf * scale                             # f32[C]

    R = N * C
    P = H * W
    x2 = x.reshape(R, P)

    in_itemsize = jnp.dtype(x.dtype).itemsize
    out_itemsize = jnp.dtype(out_dtype).itemsize
    # Native sublane tile of the input dtype (8 f32, 16 bf16, 32 int8/uint8).
    sublane = 8 * max(1, 4 // in_itemsize)
    # Row granularity: multiple of both C (grid-invariant scale/shift pattern) and the
    # sublane tile (unmasked, densely packed sublane stores).
    row_gran = (C * sublane) // math.gcd(C, sublane)

    target_bytes, vmem_limit = _tpu_block_budget()
    # Block element budget counting both the input and the (possibly wider) output tile.
    target_elems = max(row_gran * 128, target_bytes // (in_itemsize + out_itemsize))

    # ---- choose (block_rows, block_cols) ----
    if P * row_gran <= target_elems or P <= 128:
        # Full rows fit comfortably (or the plane is narrower than one lane tile).
        block_cols = P                                          # full extent: always legal
        rows_fit = max(1, target_elems // max(P, 1))
        if rows_fit >= R or R <= row_gran:
            block_rows = R                                      # full extent: always legal
        else:
            block_rows = max(row_gran, (rows_fit // row_gran) * row_gran)
    else:
        # Large plane: tile the lane axis in 128-multiples, clamp block bytes to target.
        block_rows = R if R <= row_gran else row_gran
        block_cols = max(128, (target_elems // max(block_rows, 1) // 128) * 128)
        if block_cols >= P:
            block_cols = P

    # Guarantee >= 2 grid steps along a parallel axis (v7x megacore + pipelining).
    if pl.cdiv(R, block_rows) * pl.cdiv(P, block_cols) < 2:
        if R > row_gran:
            block_rows = _round_up(pl.cdiv(R, 2), row_gran)     # multiple of row_gran, < R
        elif P > 128:
            block_cols = _round_up(pl.cdiv(P, 2), 128)          # multiple of 128, < P
        # else: tensor is tiny; a single grid step is fine.

    grid = (pl.cdiv(R, block_rows), pl.cdiv(P, block_cols))

    # Grid-invariant repeating scale/shift pattern: row r of any row tile maps to
    # channel r % C because every row-tile start is a multiple of C.
    assert block_rows % C == 0
    reps = block_rows // C
    scale_pat = jnp.tile(scale, reps).reshape(block_rows, 1)
    shift_pat = jnp.tile(shift, reps).reshape(block_rows, 1)

    cost = pl.CostEstimate(
        flops=2 * R * P,
        transcendentals=0,
        bytes_accessed=R * P * (in_itemsize + out_itemsize),
    )

    cp_kwargs = dict(dimension_semantics=("parallel", "parallel"))
    if vmem_limit is not None:
        cp_kwargs["vmem_limit_bytes"] = vmem_limit

    io_aliases = {2: 0} if (donate_x and x.dtype == out_dtype) else {}

    out2 = pl.pallas_call(
        _normalize_kernel,
        out_shape=jax.ShapeDtypeStruct((R, P), out_dtype),
        grid=grid,
        in_specs=[
            pl.BlockSpec((block_rows, 1), lambda i, j: (0, 0)),           # scale pattern
            pl.BlockSpec((block_rows, 1), lambda i, j: (0, 0)),           # shift pattern
            pl.BlockSpec((block_rows, block_cols), lambda i, j: (i, j)),  # x
        ],
        out_specs=pl.BlockSpec((block_rows, block_cols), lambda i, j: (i, j)),
        compiler_params=pltpu.CompilerParams(**cp_kwargs),
        cost_estimate=cost,
        input_output_aliases=io_aliases,
    )(scale_pat, shift_pat, x2)

    return out2.reshape(N, C, H, W)


if __name__ == "__main__":
    k1, k2, k3 = jax.random.split(jax.random.PRNGKey(0), 3)

    def reference(x, norm=255.0, mean=(0.408, 0.459, 0.482), std=(0.225, 0.224, 0.229)):
        xf = x.astype(jnp.float32)
        C = x.shape[1]
        mean_buf = jnp.asarray(mean, jnp.float32) * norm
        var_buf = jnp.asarray(std, jnp.float32) ** 2
        weight = jnp.ones((C,), jnp.float32) / norm
        return (xf - mean_buf[None, :, None, None]) / jnp.sqrt(
            var_buf[None, :, None, None]
        ) * weight[None, :, None, None]

    # Case 1: small NCHW, 128-aligned plane (exercises the forced >=2 grid-step split).
    x1 = jax.random.uniform(k1, (2, 3, 16, 16), jnp.float32, 0.0, 255.0)
    o1 = jax.block_until_ready(normalize(x1))
    assert o1.dtype == jnp.float32 and o1.shape == x1.shape
    assert jnp.allclose(o1, reference(x1), rtol=1e-5, atol=1e-5), "case 1 mismatch"

    # Case 2: larger batch (exercises row tiling + grid-invariant scale/shift pattern).
    x2 = jax.random.uniform(k2, (16, 3, 16, 16), jnp.float32, 0.0, 255.0)
    o2 = jax.block_until_ready(normalize(x2))
    assert jnp.allclose(o2, reference(x2), rtol=1e-5, atol=1e-5), "case 2 mismatch"

    # Case 3: non-128-aligned plane (exercises full-extent / masked-lane path).
    x3 = jax.random.uniform(k3, (2, 3, 10, 10), jnp.float32, 0.0, 255.0)
    o3 = jax.block_until_ready(normalize(x3))
    assert jnp.allclose(o3, reference(x3), rtol=1e-5, atol=1e-5), "case 3 mismatch"

    print("KERNEL_OK")
</pallas_src>

<mosaic_0001>
module attributes {stable_mosaic.version = 11 : i64} {
  func.func @_normalize_kernel(%arg0: i32, %arg1: i32, %arg2: memref<6x1xf32, #tpu.memory_space<vmem>>, %arg3: memref<6x1xf32, #tpu.memory_space<vmem>>, %arg4: memref<6x128xf32, #tpu.memory_space<vmem>>, %arg5: memref<6x128xf32, #tpu.memory_space<vmem>>) attributes {dimension_semantics = [#tpu.dimension_semantics<parallel>, #tpu.dimension_semantics<parallel>], iteration_bounds = array<i64: 1, 2>, scalar_prefetch = 0 : i64, scratch_operands = 0 : i64, tpu.core_type = #tpu.core_type<tc>, window_params = [{pipeline_mode = #tpu.pipeline_mode<synchronous>, transform_indices = @transform_0, window_bounds = array<i64: 6, 1>}, {pipeline_mode = #tpu.pipeline_mode<synchronous>, transform_indices = @transform_1, window_bounds = array<i64: 6, 1>}, {transform_indices = @transform_2, window_bounds = array<i64: 6, 128>}, {transform_indices = @transform_3, window_bounds = array<i64: 6, 128>}]} {
    %c0 = arith.constant 0 : index
    %c0_0 = arith.constant 0 : index
    %0 = vector.load %arg4[%c0, %c0_0] : memref<6x128xf32, #tpu.memory_space<vmem>>, vector<6x128xf32>
    %c0_1 = arith.constant 0 : index
    %c0_2 = arith.constant 0 : index
    %1 = vector.load %arg2[%c0_1, %c0_2] : memref<6x1xf32, #tpu.memory_space<vmem>>, vector<6x1xf32>
    %2 = vector.broadcast %1 : vector<6x1xf32> to vector<6x128xf32>
    %3 = arith.mulf %0, %2 : vector<6x128xf32>
    %c0_3 = arith.constant 0 : index
    %c0_4 = arith.constant 0 : index
    %4 = vector.load %arg3[%c0_3, %c0_4] : memref<6x1xf32, #tpu.memory_space<vmem>>, vector<6x1xf32>
    %5 = vector.broadcast %4 : vector<6x1xf32> to vector<6x128xf32>
    %6 = arith.addf %3, %5 : vector<6x128xf32>
    %c0_5 = arith.constant 0 : index
    %c0_6 = arith.constant 0 : index
    %7 = vector.load %arg5[%c0_5, %c0_6] : memref<6x128xf32, #tpu.memory_space<vmem>>, vector<6x128xf32>
    tpu.vector_store %arg5[%c0_5, %c0_6], %6 {strides = array<i32>} : memref<6x128xf32, #tpu.memory_space<vmem>>, vector<6x128xf32>,
    return
  }
  func.func @transform_0(%arg0: i32, %arg1: i32) -> (i32, i32) {
    %c0_i32 = arith.constant 0 : i32
    %c0_i32_0 = arith.constant 0 : i32
    %c0_i32_1 = arith.constant 0 : i32
    return %c0_i32, %c0_i32_0 : i32, i32
  }
  func.func @transform_1(%arg0: i32, %arg1: i32) -> (i32, i32) {
    %c0_i32 = arith.constant 0 : i32
    %c0_i32_0 = arith.constant 0 : i32
    %c0_i32_1 = arith.constant 0 : i32
    return %c0_i32, %c0_i32_0 : i32, i32
  }
  func.func @transform_2(%arg0: i32, %arg1: i32) -> (i32, i32) {
    %c0_i32 = arith.constant 0 : i32
    return %arg0, %arg1 : i32, i32
  }
  func.func @transform_3(%arg0: i32, %arg1: i32) -> (i32, i32) {
    %c0_i32 = arith.constant 0 : i32
    return %arg0, %arg1 : i32, i32
  }
}

</mosaic_0001>

<bundles_post_ra>
// kernel: tpu_custom_call.1
= control target key start
LH: loop header
LB: loop body
LE: loop exit
PB: predicated region body
PF: predicated region fallthrough
CT: control target
= control target key end

     0   :  { %8 = vsyncpa [#allocation3], 0  ;;  %s575_s0 = inlined_call_operand.vmem [shape: f32[6,1], index: 0, kind: input, shape index: {}]   ;;  %s576_s1 = inlined_call_operand.vmem [shape: f32[6,1], index: 1, kind: input, shape index: {}]   ;;  %s577_s2 = inlined_call_operand.vmem [shape: f32[6,256], index: 2, kind: input, shape index: {}]   ;;  %s578_s3 = inlined_call_operand.hbm [shape: f32[6,256], index: 3, kind: output, shape index: {}]  }
   0x1   :  { %10 = vsyncpa [#allocation3 + $0x1], 0  ;;  %s472_s12 = smov 0   ;;  %s474_s13 = smov 0  }
   0x2   :  { %s476_s14 = smov 0   ;;  %s478_s15 = smov 0  }
   0x3   :  { %s480_s16 = smov 0   ;;  %s482_s17 = smov 0  }
   0x4 LB: > { %s303_s18 = sadd.s32 4294967295, %s449_s17   ;;  %s304_s19 = sadd.s32 4294967294, %s449_s17   ;;  %s449_s17 = sphi %s482_s17, %s16_s17   ;;  %s445_s16 = sphi %s480_s16, %s585_s16   ;;  %s441_s15 = sphi %s478_s15, %s584_s15   ;;  %s437_s14 = sphi %s476_s14, %s583_s14   ;;  %s433_s13 = sphi %s474_s13, %s582_s13   ;;  %s429_s12 = sphi %s472_s12, %s581_s12  }
   0x5   : > { %s25_s20 = sadd.s32 1, %s445_s16  ;;  %s107_s21 = sadd.s32 1, %s437_s14 }
   0x6   : > { %p26_p0 = scmp.ge.s32.totalorder %s25_s20, 2  ;;  %p117_p1 = scmp.ne.s32.totalorder %s437_s14, %s433_s13 }
   0x7   : > { %p118_p2 = scmp.eq.s32.totalorder %s303_s18, 1  ;;  %p123_p3 = scmp.ne.s32.totalorder %s433_s13, %s429_s12 }
   0x8   : > { %s587_s20 = smov (%p26_p0, %s25_s20), 0  ;;  %p124_p5 = scmp.eq.s32.totalorder %s304_s19, 1 }
   0x9   : > { %p512_p4 = por %p118_p2, %p117_p1  ;;  %s103_s23 = ssub.s32 %s445_s16, %s587_s20 }
   0xa   : > { %p307_p6 = scmp.ge.s32.totalorder %s449_s17, 1  ;;  %p105_p7 = scmp.eq.s32.totalorder %s103_s23, 0 }
   0xb   : > { %p519_p8 = por %p124_p5, %p123_p3  ;;  %p159_p9 = scmp.lt.s32.totalorder %s449_s17, 3 }
   0xc   : > { %s525_s25 = scalar_select %p105_p7, %s437_s14, %s107_s21  }
   0xd   : > { %p160_p10 = pnand %p307_p6, %p159_p9 }
   0xe   : > { %p188_p11 = scmp.lt.s32.totalorder (!%p160_p10), %s441_s15, 1  ;;  %s183_s4 = sand.u32 (!%p160_p10), 1, %s433_s13  }
   0xf   : > { %163 = sbr.rel (%p160_p10) target bundleno = 150 (0x96), region = 32  ;;  %s308_s6 = sshll.u32 (!%p160_p10), %s183_s4, 3 }
  0x10   : > { %s311_s7 = sshll.u32 (!%p160_p10), %s441_s15, 3  ;;  %s185_s21 = scalar_lea.vmem (!%p160_p10), [#allocation2], %s308_s6 }
  0x11   : > { %s223_s19 = scalar_lea.hbm (!%p160_p10), %s578_s3, %s311_s7  ;;  %s225_s23 = sshll.u32 (!%p160_p10), %s185_s21, 4  ;;  %s226_s23 = int_to_ptr.vmem [resolvable:$true] %s225_s23 }
  0x12   : > { %s227_s26 = sshll.u32 (!%p160_p10), %s223_s19, 4  ;;  %s228_s26 = int_to_ptr.hbm [resolvable:$true] %s227_s26 }
  0x13   : > { %s385_s27 = sshra.s32 (!%p160_p10), %s228_s26, 4  ;;  %s386_s27 = int_to_ptr.hbm [resolvable:$true] %s385_s27 }
  0x14   : > { %v195_v0 = vld [vmem:[%s575_s0] sm:$0x3f]  ;;  %v451_v1 = vmov 0   ;;  %s189_s30 = scalar_select %p188_p11, %s441_s15, 1 }
  0x15   : > { %370 = vset.pattern.permute.xlu0 %v451_v1  ;;  %v202_v2 = vld [vmem:[%s576_s1] sm:$0x3f]  ;;  %s211_s15 = scalar_lea.sflag [#allocation3], %s183_s4  ;;  %s387_s28 = scalar_lea.hbm %s386_s27, 8 }
  0x16   : > { %198 = vperm.xlu0 %370, %v195_v0   ;;  %s309_s5 = sshll.u32 %s189_s30, 3  ;;  %p388_p12 = scmp.ne.s32.totalorder %s386_s27, %s387_s28 }
  0x17   : > { %s193_s10 = scalar_lea.vmem %s577_s2, %s309_s5  ;;  %s391_s5 = scalar_lea.hbm %s578_s3, 16 }
  0x18   : > { %v194_v4 = vld [vmem:[%s193_s10] sm:$0x3f]  ;;  %p389_p13 = pnand %p388_p12, %p512_p4  ;;  %p392_p1 = scmp.lt.s32.totalorder %s386_s27, %s578_s3 }
  0x19   : > { %p393_p2 = scmp.lt.s32.totalorder %s391_s5, %s387_s28 }
  0x1a   : > { %p390_p0 = pneg %p389_p13 }
  0x1b   : > { %p394_p3 = por %p393_p2, %p392_p1 }
  0x1d   : > { %p395_p5 = pnand %p394_p3, %p390_p0 }
  0x1e   : > { %205 = vperm.xlu0 %370, %v202_v2  }
  0x88   : > { %v199_v3 = vpop.permute.xlu0 %198 }
  0x89   : > { %v201_v5 = vmul.f32 %v199_v3, %v194_v4 }
  0x90   : > { %v206_v6 = vpop.permute.xlu0 %205 }
  0x91   : > { %v208_v7 = vadd.f32 %v206_v6, %v201_v5 }
  0x93   : > { %209 = vst [vmem:[%s185_s21] sm:$0x3f] %v208_v7 }
  0x94   : > { %398 = shalt.err (!%p395_p5)
}
  0x95   : > { %314 = dma.vmem_to_hbm [thread:$0]  (%p512_p4), %s226_s23, 128, %s228_s26, %s211_s15  }
  0x96 PF: > { %p320_p6 = scmp.ge.s32.totalorder %s449_s17, 2  ;;  %s239_s4 = sand.u32 1, %s429_s12  }
  0x97   : > { %s240_s8 = scalar_lea.sflag [#allocation3], %s239_s4 }
  0x98   : > { %p317_p7 = pnand %p320_p6, %p519_p8 }
  0x9a   : > { %p318_p9 = pneg %p317_p7 }
  0x9c   : > { %424 = dma.done.wait (%p318_p9), %s240_s8, 128  }
  0x9d   : > { %426 = vsyncadd (%p318_p9), %s240_s8, 4294967168  ;;  %s16_s17 = sadd.s32 1, %s449_s17   ;;  %s581_s12 = smov %s433_s13 }
  0x9e   : > { %p13_p10 = scmp.ge.s32.totalorder %s16_s17, 4   ;;  %s582_s13 = smov %s437_s14 }
  0x9f   : > { %s583_s14 = smov %s525_s25  ;;  %s584_s15 = smov %s445_s16 }
  0xa0   : > { %s585_s16 = smov %s587_s20  ;;  %15 = sbr.rel (!%p13_p10) target bundleno = 4 (0x4), region = 67 }
  0xa5   :  { %246 = vsyncpa [#allocation3], 1 }
  0xa6   :  { %248 = vsyncpa [#allocation3 + $0x1], 1 }

</bundles_post_ra>
